<compile_context>
chip_gen: v6e
topology: v6e:2x2x1
jax: 0.10.0
libtpu: 0.0.40
codegen_flags: <defaults>
</compile_context>

<pallas_src>
import math

import jax
import jax.numpy as jnp
from jax.experimental import pallas as pl
from jax.experimental.pallas import tpu as pltpu


def _factor_linear_kernel(x_ref, w_ref, b_ref, o_ref):
    # x_ref: (TILE_N, TC_pad)  w_ref: (TC_pad, TILE_K)  b_ref: (1, TILE_K) f32
    # o_ref: (TILE_N, TILE_K)
    acc = jnp.dot(x_ref[...], w_ref[...], preferred_element_type=jnp.float32)
    o_ref[...] = (acc + b_ref[...]).astype(o_ref.dtype)


def _round_up(v, m):
    return ((v + m - 1) // m) * m


def _round_down(v, m):
    return (v // m) * m


def _vmem_limit_bytes():
    """Generation-aware VMEM limit: 128 MiB/TC on v5e/v6e, 64 MiB/TC on v7x."""
    try:
        cap = int(pltpu.get_tpu_info().vmem_capacity_bytes)
    except Exception:
        cap = 64 * 1024 * 1024  # conservative fallback (v7x-sized part)
    return max(32 * 1024 * 1024, cap - 16 * 1024 * 1024)


def _plan_tiles(n, tc_pad, k_pad, x_bytes, w_bytes, out_bytes, vmem_limit):
    """Pick (tile_n, tile_k, w_resident) so all VMEM buffers fit vmem_limit."""
    slack = 2 * 1024 * 1024  # compiler-internal scratch headroom

    # ---- K tiling / weight residency ------------------------------------
    w_total = tc_pad * k_pad * w_bytes
    if w_total <= (vmem_limit - slack) // 2:
        # Whole fused weight stays VMEM-resident, single-buffered.
        tile_k = k_pad
        w_resident = True
        w_foot = w_total
    else:
        # Stream the weight along K in lane-dense blocks (double-buffered).
        w_resident = False
        budget_w = (vmem_limit - slack) // 3
        max_cols = budget_w // (2 * tc_pad * w_bytes)
        tile_k = min(k_pad, max(128, min(512, _round_down(max_cols, 128))))
        # TODO(synk): for extremely large T*C a contraction grid axis with an
        # f32 accumulator would be needed; not required at these shapes.
        w_foot = 2 * tc_pad * tile_k * w_bytes
    bias_buffers = 1 if w_resident else 2
    bias_foot = bias_buffers * 8 * tile_k * 4  # (1, tile_k) f32, sublane-padded

    # ---- N tiling --------------------------------------------------------
    per_row = 2 * tc_pad * x_bytes + 2 * tile_k * out_bytes  # dbl-buffered x+out
    avail = vmem_limit - slack - w_foot - bias_foot
    tile_n = max(8, avail // per_row)
    if tile_n >= n:
        tile_n = n  # single block over all rows (full-extent dim is legal)
    elif tile_n >= 256:
        tile_n = _round_down(tile_n, 256)  # whole 256x256 MXU passes on v6e/v7x
    else:
        tile_n = _round_down(tile_n, 8)
    return int(tile_n), int(tile_k), w_resident


def factor_linear_2d(x, weight1, weight2, bias, *, compute_dtype=jnp.bfloat16):
    """x: (N, T, C), weight1: (K, T), weight2: (K, C), bias: (K,) -> (N, K)."""
    n, t, c = x.shape
    k = weight1.shape[0]
    tc = t * c
    out_dtype = x.dtype

    # Fused rank-1 weight, built directly in transposed (T*C, K) layout in f32
    # (rounded once to the compute dtype); avoids a (K,T*C)->(T*C,K) transpose.
    w_eff_t = (
        weight1.astype(jnp.float32).T[:, None, :]      # (T, 1, K)
        * weight2.astype(jnp.float32).T[None, :, :]    # (1, C, K)
    ).reshape(tc, k)

    # Pad the contraction (lane dim of x / sublane dim of W) and K (lane dim of
    # W / out) so every tile is lane-dense and MXU passes are whole.
    contr_align = 256 if compute_dtype == jnp.bfloat16 else 128
    tc_pad = _round_up(tc, contr_align)
    k_pad = _round_up(k, 128)

    x_bytes = jnp.dtype(compute_dtype).itemsize
    w_bytes = x_bytes
    out_bytes = jnp.dtype(out_dtype).itemsize
    vmem_limit = _vmem_limit_bytes()
    tile_n, tile_k, w_resident = _plan_tiles(
        n, tc_pad, k_pad, x_bytes, w_bytes, out_bytes, vmem_limit
    )
    k_pad = _round_up(k_pad, tile_k)  # make K divisible by the K tile

    # Pad / cast operands (zero padding is numerically neutral).
    w_eff_t = w_eff_t.astype(compute_dtype)
    if (tc_pad != tc) or (k_pad != k):
        w_eff_t = jnp.pad(w_eff_t, ((0, tc_pad - tc), (0, k_pad - k)))
    bias_p = bias.astype(jnp.float32).reshape(1, k)
    if k_pad != k:
        bias_p = jnp.pad(bias_p, ((0, 0), (0, k_pad - k)))
    x2d = x.reshape(n, tc).astype(compute_dtype)
    if tc_pad != tc:
        x2d = jnp.pad(x2d, ((0, 0), (0, tc_pad - tc)))

    n_pad = _round_up(n, tile_n)
    if n_pad != n:
        x2d = jnp.pad(x2d, ((0, n_pad - n), (0, 0)))
    grid_n = n_pad // tile_n
    grid_k = k_pad // tile_k

    # BlockSpecs: x streams over N (reused across K steps); W/bias are either
    # resident (single-buffered, constant index) or streamed over K.
    x_spec = pl.BlockSpec((tile_n, tc_pad), lambda i, j: (i, 0))
    if w_resident:
        w_spec = pl.BlockSpec((tc_pad, tile_k), lambda i, j: (0, j),
                              pipeline_mode=pl.Buffered(1))
        b_spec = pl.BlockSpec((1, tile_k), lambda i, j: (0, j),
                              pipeline_mode=pl.Buffered(1))
    else:
        w_spec = pl.BlockSpec((tc_pad, tile_k), lambda i, j: (0, j))
        b_spec = pl.BlockSpec((1, tile_k), lambda i, j: (0, j))
    out_spec = pl.BlockSpec((tile_n, tile_k), lambda i, j: (i, j))

    w_hbm_reads = 1 if w_resident else grid_n
    cost = pl.CostEstimate(
        flops=2 * n_pad * tc_pad * k_pad,
        transcendentals=0,
        bytes_accessed=(
            n_pad * tc_pad * x_bytes                 # x
            + tc_pad * k_pad * w_bytes * w_hbm_reads  # fused weight
            + k_pad * 4                               # bias
            + n_pad * k_pad * out_bytes               # output
        ),
    )

    out_padded = pl.pallas_call(
        _factor_linear_kernel,
        out_shape=jax.ShapeDtypeStruct((n_pad, k_pad), out_dtype),
        grid_spec=pltpu.PrefetchScalarGridSpec(
            num_scalar_prefetch=0,
            grid=(grid_n, grid_k),
            in_specs=[x_spec, w_spec, b_spec],
            out_specs=out_spec,
        ),
        compiler_params=pltpu.CompilerParams(
            dimension_semantics=("parallel", "parallel"),
            vmem_limit_bytes=int(vmem_limit),
        ),
        cost_estimate=cost,
    )(x2d, w_eff_t, bias_p)

    return out_padded[:n, :k]


def init_params(key, in_shape, out_features):
    """Matches nn.init.kaiming_uniform_(w, a=sqrt(5)) => U(-1/sqrt(fan_in), 1/sqrt(fan_in))."""
    t, c = in_shape
    k1, k2 = jax.random.split(key)
    bound1 = 1.0 / math.sqrt(t)  # fan_in of weight1 (K, T) is T
    bound2 = 1.0 / math.sqrt(c)  # fan_in of weight2 (K, C) is C
    weight1 = jax.random.uniform(
        k1, (out_features, t), jnp.float32, minval=-bound1, maxval=bound1
    )
    weight2 = jax.random.uniform(
        k2, (out_features, c), jnp.float32, minval=-bound2, maxval=bound2
    )
    bias = jnp.zeros((out_features,), jnp.float32)
    return weight1, weight2, bias


if __name__ == "__main__":
    # Small shapes consistent with the module: input (N, T, C) -> output (N, K).
    N, T, C, K = 4, 8, 32, 16

    key = jax.random.PRNGKey(0)
    kx, kp = jax.random.split(key)
    x = jax.random.normal(kx, (N, T, C), jnp.float32)
    weight1, weight2, bias = init_params(kp, (T, C), K)

    out = factor_linear_2d(x, weight1, weight2, bias)
    out = jax.block_until_ready(out)

    # Pure-JAX f32 reference (same math as the PyTorch forward).
    ref = jnp.matmul(x, weight2.T)                 # (N, T, K)
    ref = jnp.sum(ref * weight1.T[None], axis=-2)  # (N, K)
    ref = ref + bias
    assert out.shape == (N, K)
    # Kernel runs the matmul with bf16 operands (f32 accumulation), so compare
    # with a bf16-appropriate tolerance.
    max_err = float(jnp.max(jnp.abs(out - ref)))
    assert jnp.allclose(out, ref, atol=1e-2, rtol=1e-2), (
        f"mismatch vs reference (max abs err {max_err})"
    )

    print("KERNEL_OK")
</pallas_src>

<mosaic_0001>
module attributes {stable_mosaic.version = 11 : i64} {
  func.func @_factor_linear_kernel(%arg0: i32, %arg1: i32, %arg2: memref<4x256xbf16, #tpu.memory_space<vmem>>, %arg3: memref<256x128xbf16, #tpu.memory_space<vmem>>, %arg4: memref<1x128xf32, #tpu.memory_space<vmem>>, %arg5: memref<4x128xf32, #tpu.memory_space<vmem>>) attributes {dimension_semantics = [#tpu.dimension_semantics<parallel>, #tpu.dimension_semantics<parallel>], iteration_bounds = array<i64: 1, 1>, scalar_prefetch = 0 : i64, scratch_operands = 0 : i64, tpu.core_type = #tpu.core_type<tc>, window_params = [{transform_indices = @transform_0, window_bounds = array<i64: 4, 256>}, {pipeline_mode = #tpu.pipeline_mode<synchronous>, transform_indices = @transform_1, window_bounds = array<i64: 256, 128>}, {pipeline_mode = #tpu.pipeline_mode<synchronous>, transform_indices = @transform_2, window_bounds = array<i64: 1, 128>}, {transform_indices = @transform_3, window_bounds = array<i64: 4, 128>}]} {
    %c0 = arith.constant 0 : index
    %c0_0 = arith.constant 0 : index
    %0 = vector.load %arg2[%c0, %c0_0] : memref<4x256xbf16, #tpu.memory_space<vmem>>, vector<4x256xbf16>
    %c0_1 = arith.constant 0 : index
    %c0_2 = arith.constant 0 : index
    %1 = vector.load %arg3[%c0_1, %c0_2] : memref<256x128xbf16, #tpu.memory_space<vmem>>, vector<256x128xbf16>
    %cst = arith.constant dense<0.000000e+00> : vector<4x128xf32>
    %2 = tpu.matmul %0, %1, %cst {dimension_numbers = #tpu.dot_dimension_numbers<[1], [0], [0], [1], [0, 0, 1, 1], [], []>} : vector<4x256xbf16>, vector<256x128xbf16>, vector<4x128xf32> -> vector<4x128xf32>
    %c0_3 = arith.constant 0 : index
    %c0_4 = arith.constant 0 : index
    %3 = vector.load %arg4[%c0_3, %c0_4] : memref<1x128xf32, #tpu.memory_space<vmem>>, vector<1x128xf32>
    %4 = vector.broadcast %3 : vector<1x128xf32> to vector<4x128xf32>
    %5 = arith.addf %2, %4 : vector<4x128xf32>
    %c0_5 = arith.constant 0 : index
    %c0_6 = arith.constant 0 : index
    %6 = vector.load %arg5[%c0_5, %c0_6] : memref<4x128xf32, #tpu.memory_space<vmem>>, vector<4x128xf32>
    tpu.vector_store %arg5[%c0_5, %c0_6], %5 {strides = array<i32>} : memref<4x128xf32, #tpu.memory_space<vmem>>, vector<4x128xf32>,
    return
  }
  func.func @transform_0(%arg0: i32, %arg1: i32) -> (i32, i32) {
    %c0_i32 = arith.constant 0 : i32
    %c0_i32_0 = arith.constant 0 : i32
    return %arg0, %c0_i32 : i32, i32
  }
  func.func @transform_1(%arg0: i32, %arg1: i32) -> (i32, i32) {
    %c0_i32 = arith.constant 0 : i32
    %c0_i32_0 = arith.constant 0 : i32
    return %c0_i32, %arg1 : i32, i32
  }
  func.func @transform_2(%arg0: i32, %arg1: i32) -> (i32, i32) {
    %c0_i32 = arith.constant 0 : i32
    %c0_i32_0 = arith.constant 0 : i32
    return %c0_i32, %arg1 : i32, i32
  }
  func.func @transform_3(%arg0: i32, %arg1: i32) -> (i32, i32) {
    %c0_i32 = arith.constant 0 : i32
    return %arg0, %arg1 : i32, i32
  }
}

</mosaic_0001>

<bundles_post_ra>
// kernel: tpu_custom_call.1
= control target key start
LH: loop header
LB: loop body
LE: loop exit
PB: predicated region body
PF: predicated region fallthrough
CT: control target
= control target key end

     0   :  { %8 = vsyncpa [#allocation3], 0  ;;  %s410_s0 = inlined_call_operand.hbm [shape: bf16[4,256], index: 0, kind: input, shape index: {}]   ;;  %s411_s1 = inlined_call_operand.hbm [shape: bf16[256,128], index: 1, kind: input, shape index: {}]   ;;  %s412_s2 = inlined_call_operand.vmem [shape: f32[1,128], index: 2, kind: input, shape index: {}]   ;;  %s413_s3 = inlined_call_operand.hbm [shape: f32[4,128], index: 3, kind: output, shape index: {}]  }
   0x1   :  { %9 = vsyncpa [#allocation6], 0 }
   0x2   :  { %10 = vsyncpa [#allocation4], 0  ;;  %s373_s12 = smov [#allocation2]   ;;  %s374_s14 = smov [#allocation5]  }
   0x3   :  { %s17_s13 = sshll.u32 %s373_s12, 4  ;;  %s26_s15 = sshll.u32 %s374_s14, 4  ;;  %s18_s13 = int_to_ptr.vmem [resolvable:$true] %s17_s13  ;;  %s27_s15 = int_to_ptr.vmem [resolvable:$true] %s26_s15 }
   0x4   :  { %s315_s16 = scalar_lea.vmem %s18_s13, 64  ;;  %p320_p1 = scmp.lt.s32.totalorder %s18_s13, %s18_s13 }
   0x5   :  { %p316_p0 = scmp.ne.s32.totalorder %s18_s13, %s315_s16  ;;  %p321_p2 = scmp.lt.s32.totalorder %s315_s16, %s315_s16 }
   0x7   :  { %p322_p3 = por %p321_p2, %p320_p1 }
   0x9   :  { %p323_p4 = pnand %p322_p3, %p316_p0 }
   0xb   :  { %326 = shalt.err (!%p323_p4)
}
   0xc   :  { %20 = dma.hbm_to_vmem [thread:$0]  %s410_s0, 64, %s18_s13, [#allocation3]  }
   0xd   :  { %s335_s19 = scalar_lea.vmem %s27_s15, 2048  ;;  %p340_p6 = scmp.lt.s32.totalorder %s27_s15, %s27_s15 }
   0xe   :  { %p336_p5 = scmp.ne.s32.totalorder %s27_s15, %s335_s19  ;;  %p341_p7 = scmp.lt.s32.totalorder %s335_s19, %s335_s19 }
  0x10   :  { %p342_p8 = por %p341_p7, %p340_p6 }
  0x12   :  { %p343_p9 = pnand %p342_p8, %p336_p5 }
  0x14   :  { %346 = shalt.err (!%p343_p9)
}
  0x15   :  { %s375_s20 = smov 64   ;;  %s376_s21 = smov 4  }
  0x16   :  { %32 = dma.hbm_to_vmem [thread:$0]  %s411_s1, 2048, %s27_s15, [#allocation6], %s375_s20, %s375_s20, %s376_s21  }
  0x17   :  { %367 = dma.done.wait [#allocation3], 64  }
  0x18   :  { %368 = vsyncadd [#allocation3], 4294967232 }
  0x19   :  { %369 = dma.done.wait [#allocation6], 2048  }
  0x1a   :  { %370 = vsyncadd [#allocation6], 4294965248  ;;  %v291_v0 = vld [vmem:[#allocation5 + $0x78] sm:$0xff]   ;;  %v293_v2 = vld [vmem:[#allocation5 + $0x70] sm:$0xff]   ;;  %s377_s24 = smov [#allocation7]  }
  0x1b   :  { %v292_v1 = vld [vmem:[#allocation5 + $0x38] sm:$0xff]   ;;  %264 = vmatprep.subr.bf16.mxu0 %v291_v0  ;;  %v294_v3 = vld [vmem:[#allocation5 + $0x30] sm:$0xff]   ;;  %v295_v4 = vld [vmem:[#allocation5 + $0x68] sm:$0xff]   ;;  %s236_s25 = sshll.u32 %s377_s24, 4  ;;  %s237_s25 = int_to_ptr.vmem [resolvable:$true] %s236_s25 }
  0x1c   :  { %265 = vmatpush3.bf16.msra.mxu0 %v292_v1  ;;  %v296_v5 = vld [vmem:[#allocation5 + $0x28] sm:$0xff]   ;;  %v297_v6 = vld [vmem:[#allocation5 + $0x60] sm:$0xff]   ;;  %v299_v8 = vld [vmem:[#allocation5 + $0x58] sm:$0xff]   ;;  %s347_s26 = scalar_lea.vmem %s237_s25, 64  ;;  %p352_p11 = scmp.lt.s32.totalorder %s237_s25, %s237_s25 }
  0x1d   :  { %266 = vmatprep.subr.bf16.mxu0 %v293_v2  ;;  %v298_v7 = vld [vmem:[#allocation5 + $0x20] sm:$0xff]   ;;  %v300_v9 = vld [vmem:[#allocation5 + $0x18] sm:$0xff]   ;;  %v301_v10 = vld [vmem:[#allocation5 + $0x50] sm:$0xff]   ;;  %p348_p10 = scmp.ne.s32.totalorder %s237_s25, %s347_s26  ;;  %p353_p12 = scmp.lt.s32.totalorder %s347_s26, %s347_s26 }
  0x1e   :  { %v247_v11 = vld.sshfl [vmem:[#allocation2] sm:$0x33 pattern:$0x76325410]  ;;  %v302_v13 = vld [vmem:[#allocation5 + $0x10] sm:$0xff]   ;;  %v303_v14 = vld [vmem:[#allocation5 + $0x48] sm:$0xff]  }
  0x1f   :  { %v90_v12 = vcombine.high %v247_v11, %v247_v11  ;;  %v304_v15 = vld [vmem:[#allocation5 + $0x8] sm:$0xff]   ;;  %v305_v16 = vld [vmem:[#allocation5 + $0x40] sm:$0xff]   ;;  %v246_v19 = vld [vmem:[%s412_s2] ss:$0 sm:$0xff]  ;;  %p354_p13 = por %p353_p12, %p352_p11 }
  0x20   :  { %267 = vmatpush3.bf16.msra.mxu0 %v294_v3  ;;  %v306_v17 = vld [vmem:[#allocation5] sm:$0xff]  }
  0x21   :  { %268 = vmatprep.subr.bf16.mxu0 %v295_v4  ;;  %221 = vmatprep.mubr.bf16.mxu0 %v90_v12  ;;  %p355_p0 = pnand %p354_p13, %p348_p10 }
  0x24   :  { %269 = vmatpush3.bf16.msra.mxu0 %v296_v5 }
  0x25   :  { %270 = vmatprep.subr.bf16.mxu0 %v297_v6 }
  0x28   :  { %271 = vmatpush3.bf16.msra.mxu0 %v298_v7 }
  0x29   :  { %272 = vmatprep.subr.bf16.mxu0 %v299_v8 }
  0x2c   :  { %273 = vmatpush3.bf16.msra.mxu0 %v300_v9 }
  0x2d   :  { %274 = vmatprep.subr.bf16.mxu0 %v301_v10 }
  0x30   :  { %275 = vmatpush3.bf16.msra.mxu0 %v302_v13 }
  0x31   :  { %276 = vmatprep.subr.bf16.mxu0 %v303_v14 }
  0x34   :  { %277 = vmatpush3.bf16.msra.mxu0 %v304_v15 }
  0x35   :  { %278 = vmatprep.subr.bf16.mxu0 %v305_v16 }
  0x38   :  { %279 = vmatpush3.bf16.msra.mxu0 %v306_v17 }
  0x3b   :  { %222 = vmatmul.mubr.bf16.vlgmr.msra.gmra.mxu0 %v247_v11 }
  0xfb   :  { %v280_v18 = vpop.f32.mrf.mxu0 }
  0xfd   :  { %v281_v20 = vpop.f32.mrf.mxu0 }
  0xfe   :  { %v282_v21 = vadd.f32 %v281_v20, %v280_v18 }
  0xff   :  { %v283_v22 = vpop.f32.mrf.mxu0 }
 0x100   :  { %v224_v23 = vadd.f32 %v282_v21, %v246_v19 }
 0x101   :  { %v284_v24 = vpop.f32.mrf.mxu0 }
 0x102   :  { %229 = vst [vmem:[#allocation7] sm:$0xf] %v224_v23 }
 0x103   :  { %358 = shalt.err (!%p355_p0)
}
 0x104   :  { %239 = dma.vmem_to_hbm [thread:$0]  %s237_s25, 64, %s413_s3, [#allocation4]  }
 0x105   :  { %371 = dma.done.wait [#allocation4], 64  }
 0x106   :  { %372 = vsyncadd [#allocation4], 4294967232 }
 0x107   :  { %243 = vsyncpa [#allocation3], 1 }
 0x108   :  { %244 = vsyncpa [#allocation6], 1 }
 0x109   :  { %245 = vsyncpa [#allocation4], 1 }

</bundles_post_ra>
